<compile_context>
chip_gen: v5e
topology: v5e:2x2
jax: 0.10.0
libtpu: 0.0.40
codegen_flags: <defaults>
</compile_context>

<pallas_src>
import jax
import jax.numpy as jnp
from jax.experimental import pallas as pl
from jax.experimental.pallas import tpu as pltpu

NC = 121              # nc in the torch module
IN_DIM = 2 * NC       # 242
IN_PAD = 256          # 242 padded up to a multiple of 128
H1 = 128
H2 = 64
H2P = 128             # H2 padded to a full vreg lane width
OUT_DIM = 1
NEG_SLOPE = 0.2


def _round_up(x, m):
    return ((x + m - 1) // m) * m


# ----------------------------- spectral norm (glue, plain JAX) ---------------
def _l2normalize(v, eps=1e-12):
    return v / (jnp.linalg.norm(v) + eps)


def spectral_normalize(w, u, power_iterations=1):
    """w: (out, in) torch-layout weight, u: (1, out). Returns w / sigma."""
    for _ in range(power_iterations):
        v = _l2normalize(u @ w)        # (1, in)
        u = _l2normalize(v @ w.T)      # (1, out)
    sigma = jnp.sum((u @ w) * v)
    return w / sigma


# ----------------------------- Pallas kernel ---------------------------------
def mlp_kernel(x_ref, w1_ref, b1_ref, w2_ref, b2_ref, w3_ref, b3_ref, o_ref):
    x = x_ref[...]                                                    # (TM, 256) bf16
    h1 = jnp.dot(x, w1_ref[...],
                 preferred_element_type=jnp.float32) + b1_ref[...]    # (TM, 128) f32
    h1 = jnp.where(h1 > 0, h1, NEG_SLOPE * h1)                        # LeakyReLU(0.2)
    h2 = jnp.dot(h1.astype(jnp.bfloat16), w2_ref[...],
                 preferred_element_type=jnp.float32) + b2_ref[...]    # (TM, 128) f32
    h2 = jnp.where(h2 > 0, h2, NEG_SLOPE * h2)                        # LeakyReLU(0.2)
    # Final (H2 -> 1) layer: VPU multiply + lane reduce (keeps it off the MXU).
    out = jnp.sum(h2 * w3_ref[...], axis=-1, keepdims=True) + b3_ref[...]
    o_ref[...] = out.astype(o_ref.dtype)                              # (TM, 1)


def kd99inter_forward(x, params, tm=512):
    """x: (B, 2*NC) float32. params: kernel-ready (padded/cast) parameters."""
    B = x.shape[0]
    # Tile size: multiple of 8, no larger than needed for small batches.
    tm = _round_up(max(8, min(tm, _round_up(B, 8))), 8)
    b_pad = _round_up(B, tm)
    grid = (b_pad // tm,)

    # Zero-pad batch (-> multiple of TM) and features (242 -> 256), cast to bf16.
    x_p = jnp.pad(x, ((0, b_pad - B), (0, IN_PAD - IN_DIM))).astype(jnp.bfloat16)

    out = pl.pallas_call(
        mlp_kernel,
        out_shape=jax.ShapeDtypeStruct((b_pad, OUT_DIM), jnp.float32),
        grid=grid,
        in_specs=[
            pl.BlockSpec((tm, IN_PAD), lambda i: (i, 0)),    # x: tiled over batch
            pl.BlockSpec((IN_PAD, H1), lambda i: (0, 0)),    # weights resident
            pl.BlockSpec((1, H1), lambda i: (0, 0)),
            pl.BlockSpec((H1, H2P), lambda i: (0, 0)),
            pl.BlockSpec((1, H2P), lambda i: (0, 0)),
            pl.BlockSpec((1, H2P), lambda i: (0, 0)),
            pl.BlockSpec((1, 1), lambda i: (0, 0)),
        ],
        out_specs=pl.BlockSpec((tm, OUT_DIM), lambda i: (i, 0)),
        compiler_params=pltpu.CompilerParams(
            dimension_semantics=("parallel",)),              # dual-TC sharding on v7x
    )(x_p, params["w1t"], params["b1"], params["w2t"], params["b2"],
      params["w3r"], params["b3"])
    # x.view(-1, 1) in torch -> (B, 1); drop batch padding.
    return out[:B]


# ----------------------------- parameter init / prep -------------------------
def init_raw_params(key):
    ks = jax.random.split(key, 6)
    # torch layout: weight (out, in); bias initialized to 0 in the Linear subclass.
    return {
        "w1": jax.random.normal(ks[0], (H1, IN_DIM), jnp.float32) * 0.05,
        "w2": jax.random.normal(ks[1], (H2, H1), jnp.float32) * 0.05,
        "w3": jax.random.normal(ks[2], (OUT_DIM, H2), jnp.float32) * 0.05,
        "u1": jax.random.normal(ks[3], (1, H1), jnp.float32),
        "u2": jax.random.normal(ks[4], (1, H2), jnp.float32),
        "u3": jax.random.normal(ks[5], (1, OUT_DIM), jnp.float32),
        "b1": jnp.zeros((H1,), jnp.float32),
        "b2": jnp.zeros((H2,), jnp.float32),
        "b3": jnp.zeros((OUT_DIM,), jnp.float32),
    }


def prepare_params(raw):
    """Spectral-normalize (1 power iteration, as in torch forward), then
    transpose / zero-pad / cast into kernel-ready layout."""
    # TODO(synk): torch updates the `u` buffer every training-mode forward; here the
    # power iteration runs once at parameter-prep time (inference semantics).
    w1b = spectral_normalize(raw["w1"], raw["u1"], 1)        # (128, 242)
    w2b = spectral_normalize(raw["w2"], raw["u2"], 1)        # (64, 128)
    w3b = spectral_normalize(raw["w3"], raw["u3"], 1)        # (1, 64)

    w1t = jnp.zeros((IN_PAD, H1), jnp.float32).at[:IN_DIM, :].set(w1b.T)
    w2t = jnp.zeros((H1, H2P), jnp.float32).at[:, :H2].set(w2b.T)
    w3r = jnp.zeros((1, H2P), jnp.float32).at[:, :H2].set(w3b)
    b2p = jnp.zeros((1, H2P), jnp.float32).at[:, :H2].set(raw["b2"].reshape(1, H2))

    kernel_params = {
        "w1t": w1t.astype(jnp.bfloat16),
        "b1": raw["b1"].reshape(1, H1),
        "w2t": w2t.astype(jnp.bfloat16),
        "b2": b2p,
        "w3r": w3r,                       # f32 row for the VPU mul+reduce
        "b3": raw["b3"].reshape(1, 1),
    }
    math_params = {"w1b": w1b, "w2b": w2b, "w3b": w3b,
                   "b1": raw["b1"], "b2": raw["b2"], "b3": raw["b3"]}
    return kernel_params, math_params


# ----------------------------- references ------------------------------------
def reference_forward_matched(x, p):
    """Same math/precision as the kernel (bf16 MXU inputs, f32 accumulate)."""
    xb = jnp.pad(x, ((0, 0), (0, IN_PAD - IN_DIM))).astype(jnp.bfloat16)
    h1 = jnp.dot(xb, p["w1t"], preferred_element_type=jnp.float32) + p["b1"]
    h1 = jnp.where(h1 > 0, h1, NEG_SLOPE * h1)
    h2 = jnp.dot(h1.astype(jnp.bfloat16), p["w2t"],
                 preferred_element_type=jnp.float32) + p["b2"]
    h2 = jnp.where(h2 > 0, h2, NEG_SLOPE * h2)
    return jnp.sum(h2 * p["w3r"], axis=-1, keepdims=True) + p["b3"]


def reference_forward_fp32(x, m):
    """Exact fp32 torch semantics (unpadded weights)."""
    h1 = x @ m["w1b"].T + m["b1"]
    h1 = jnp.where(h1 > 0, h1, NEG_SLOPE * h1)
    h2 = h1 @ m["w2b"].T + m["b2"]
    h2 = jnp.where(h2 > 0, h2, NEG_SLOPE * h2)
    return (h2 @ m["w3b"].T + m["b3"]).reshape(-1, 1)


if __name__ == "__main__":
    key = jax.random.PRNGKey(0)
    kp, kx = jax.random.split(key)
    kernel_params, math_params = prepare_params(init_raw_params(kp))

    B = 300  # small, non-multiple of the tile size to exercise batch padding
    x = jax.random.normal(kx, (B, IN_DIM), jnp.float32)

    out = kd99inter_forward(x, kernel_params, tm=128)  # grid = (3,)
    out = jax.block_until_ready(out)
    assert out.shape == (B, 1), out.shape

    ref_m = reference_forward_matched(x, kernel_params)
    err_m = jnp.max(jnp.abs(out - ref_m))
    assert jnp.allclose(out, ref_m, atol=1e-2, rtol=1e-2), f"matched-ref err {err_m}"

    ref_f = reference_forward_fp32(x, math_params)
    err_f = jnp.max(jnp.abs(out - ref_f))
    assert jnp.allclose(out, ref_f, atol=1e-1, rtol=1e-1), f"fp32-ref err {err_f}"

    print("KERNEL_OK")
</pallas_src>

<mosaic_0001>
module attributes {stable_mosaic.version = 11 : i64} {
  func.func @mlp_kernel(%arg0: i32, %arg1: memref<128x256xbf16, #tpu.memory_space<vmem>>, %arg2: memref<256x128xbf16, #tpu.memory_space<vmem>>, %arg3: memref<1x128xf32, #tpu.memory_space<vmem>>, %arg4: memref<128x128xbf16, #tpu.memory_space<vmem>>, %arg5: memref<1x128xf32, #tpu.memory_space<vmem>>, %arg6: memref<1x128xf32, #tpu.memory_space<vmem>>, %arg7: memref<1x1xf32, #tpu.memory_space<vmem>>, %arg8: memref<128x1xf32, #tpu.memory_space<vmem>>) attributes {dimension_semantics = [#tpu.dimension_semantics<parallel>], iteration_bounds = array<i64: 3>, scalar_prefetch = 0 : i64, scratch_operands = 0 : i64, tpu.core_type = #tpu.core_type<tc>, window_params = [{transform_indices = @transform_0, window_bounds = array<i64: 128, 256>}, {pipeline_mode = #tpu.pipeline_mode<synchronous>, transform_indices = @transform_1, window_bounds = array<i64: 256, 128>}, {pipeline_mode = #tpu.pipeline_mode<synchronous>, transform_indices = @transform_2, window_bounds = array<i64: 1, 128>}, {pipeline_mode = #tpu.pipeline_mode<synchronous>, transform_indices = @transform_3, window_bounds = array<i64: 128, 128>}, {pipeline_mode = #tpu.pipeline_mode<synchronous>, transform_indices = @transform_4, window_bounds = array<i64: 1, 128>}, {pipeline_mode = #tpu.pipeline_mode<synchronous>, transform_indices = @transform_5, window_bounds = array<i64: 1, 128>}, {pipeline_mode = #tpu.pipeline_mode<synchronous>, transform_indices = @transform_6, window_bounds = array<i64: 1, 1>}, {transform_indices = @transform_7, window_bounds = array<i64: 128, 1>}]} {
    %c0 = arith.constant 0 : index
    %c0_0 = arith.constant 0 : index
    %0 = vector.load %arg1[%c0, %c0_0] : memref<128x256xbf16, #tpu.memory_space<vmem>>, vector<128x256xbf16>
    %c0_1 = arith.constant 0 : index
    %c0_2 = arith.constant 0 : index
    %1 = vector.load %arg2[%c0_1, %c0_2] : memref<256x128xbf16, #tpu.memory_space<vmem>>, vector<256x128xbf16>
    %cst = arith.constant dense<0.000000e+00> : vector<128x128xf32>
    %2 = tpu.matmul %0, %1, %cst {dimension_numbers = #tpu.dot_dimension_numbers<[1], [0], [0], [1], [0, 0, 1, 1], [], []>} : vector<128x256xbf16>, vector<256x128xbf16>, vector<128x128xf32> -> vector<128x128xf32>
    %c0_3 = arith.constant 0 : index
    %c0_4 = arith.constant 0 : index
    %3 = vector.load %arg3[%c0_3, %c0_4] : memref<1x128xf32, #tpu.memory_space<vmem>>, vector<1x128xf32>
    %4 = vector.broadcast %3 : vector<1x128xf32> to vector<128x128xf32>
    %5 = arith.addf %2, %4 : vector<128x128xf32>
    %cst_5 = arith.constant 0.000000e+00 : f32
    %6 = vector.broadcast %cst_5 : f32 to vector<128x128xf32>
    %7 = arith.cmpf ogt, %5, %6 : vector<128x128xf32>
    %cst_6 = arith.constant 2.000000e-01 : f32
    %8 = vector.broadcast %cst_6 : f32 to vector<128x128xf32>
    %9 = arith.mulf %8, %5 : vector<128x128xf32>
    %10 = arith.select %7, %5, %9 : vector<128x128xi1>, vector<128x128xf32>
    %11 = arith.truncf %10 : vector<128x128xf32> to vector<128x128xbf16>
    %c0_7 = arith.constant 0 : index
    %c0_8 = arith.constant 0 : index
    %12 = vector.load %arg4[%c0_7, %c0_8] : memref<128x128xbf16, #tpu.memory_space<vmem>>, vector<128x128xbf16>
    %cst_9 = arith.constant dense<0.000000e+00> : vector<128x128xf32>
    %13 = tpu.matmul %11, %12, %cst_9 {dimension_numbers = #tpu.dot_dimension_numbers<[1], [0], [0], [1], [0, 0, 1, 1], [], []>} : vector<128x128xbf16>, vector<128x128xbf16>, vector<128x128xf32> -> vector<128x128xf32>
    %c0_10 = arith.constant 0 : index
    %c0_11 = arith.constant 0 : index
    %14 = vector.load %arg5[%c0_10, %c0_11] : memref<1x128xf32, #tpu.memory_space<vmem>>, vector<1x128xf32>
    %15 = vector.broadcast %14 : vector<1x128xf32> to vector<128x128xf32>
    %16 = arith.addf %13, %15 : vector<128x128xf32>
    %cst_12 = arith.constant 0.000000e+00 : f32
    %17 = vector.broadcast %cst_12 : f32 to vector<128x128xf32>
    %18 = arith.cmpf ogt, %16, %17 : vector<128x128xf32>
    %cst_13 = arith.constant 2.000000e-01 : f32
    %19 = vector.broadcast %cst_13 : f32 to vector<128x128xf32>
    %20 = arith.mulf %19, %16 : vector<128x128xf32>
    %21 = arith.select %18, %16, %20 : vector<128x128xi1>, vector<128x128xf32>
    %c0_14 = arith.constant 0 : index
    %c0_15 = arith.constant 0 : index
    %22 = vector.load %arg6[%c0_14, %c0_15] : memref<1x128xf32, #tpu.memory_space<vmem>>, vector<1x128xf32>
    %23 = vector.broadcast %22 : vector<1x128xf32> to vector<128x128xf32>
    %24 = arith.mulf %21, %23 : vector<128x128xf32>
    %cst_16 = arith.constant dense<0.000000e+00> : vector<128xf32>
    %25 = vector.multi_reduction <add>, %24, %cst_16 [1] : vector<128x128xf32> to vector<128xf32>
    %26 = vector.shape_cast %25 : vector<128xf32> to vector<128x1xf32>
    %c0_17 = arith.constant 0 : index
    %c0_18 = arith.constant 0 : index
    %27 = vector.load %arg7[%c0_17, %c0_18] : memref<1x1xf32, #tpu.memory_space<vmem>>, vector<1x1xf32>
    %28 = vector.broadcast %27 : vector<1x1xf32> to vector<128x1xf32>
    %29 = arith.addf %26, %28 : vector<128x1xf32>
    %c0_19 = arith.constant 0 : index
    %c0_20 = arith.constant 0 : index
    %30 = vector.load %arg8[%c0_19, %c0_20] : memref<128x1xf32, #tpu.memory_space<vmem>>, vector<128x1xf32>
    tpu.vector_store %arg8[%c0_19, %c0_20], %29 {strides = array<i32>} : memref<128x1xf32, #tpu.memory_space<vmem>>, vector<128x1xf32>,
    return
  }
  func.func @transform_0(%arg0: i32) -> (i32, i32) {
    %c0_i32 = arith.constant 0 : i32
    %c0_i32_0 = arith.constant 0 : i32
    return %arg0, %c0_i32 : i32, i32
  }
  func.func @transform_1(%arg0: i32) -> (i32, i32) {
    %c0_i32 = arith.constant 0 : i32
    %c0_i32_0 = arith.constant 0 : i32
    %c0_i32_1 = arith.constant 0 : i32
    return %c0_i32, %c0_i32_0 : i32, i32
  }
  func.func @transform_2(%arg0: i32) -> (i32, i32) {
    %c0_i32 = arith.constant 0 : i32
    %c0_i32_0 = arith.constant 0 : i32
    %c0_i32_1 = arith.constant 0 : i32
    return %c0_i32, %c0_i32_0 : i32, i32
  }
  func.func @transform_3(%arg0: i32) -> (i32, i32) {
    %c0_i32 = arith.constant 0 : i32
    %c0_i32_0 = arith.constant 0 : i32
    %c0_i32_1 = arith.constant 0 : i32
    return %c0_i32, %c0_i32_0 : i32, i32
  }
  func.func @transform_4(%arg0: i32) -> (i32, i32) {
    %c0_i32 = arith.constant 0 : i32
    %c0_i32_0 = arith.constant 0 : i32
    %c0_i32_1 = arith.constant 0 : i32
    return %c0_i32, %c0_i32_0 : i32, i32
  }
  func.func @transform_5(%arg0: i32) -> (i32, i32) {
    %c0_i32 = arith.constant 0 : i32
    %c0_i32_0 = arith.constant 0 : i32
    %c0_i32_1 = arith.constant 0 : i32
    return %c0_i32, %c0_i32_0 : i32, i32
  }
  func.func @transform_6(%arg0: i32) -> (i32, i32) {
    %c0_i32 = arith.constant 0 : i32
    %c0_i32_0 = arith.constant 0 : i32
    %c0_i32_1 = arith.constant 0 : i32
    return %c0_i32, %c0_i32_0 : i32, i32
  }
  func.func @transform_7(%arg0: i32) -> (i32, i32) {
    %c0_i32 = arith.constant 0 : i32
    %c0_i32_0 = arith.constant 0 : i32
    return %arg0, %c0_i32 : i32, i32
  }
}

</mosaic_0001>

<bundles_post_ra>
// kernel: tpu_custom_call.1
= control target key start
LH: loop header
LB: loop body
LE: loop exit
PB: predicated region body
PF: predicated region fallthrough
CT: control target
= control target key end

     0   :  { %s1792_s0 = inlined_call_operand.hbm [shape: bf16[384,256], index: 0, kind: input, shape index: {}]   ;;  %s1793_s1 = inlined_call_operand.hbm [shape: bf16[256,128], index: 1, kind: input, shape index: {}]   ;;  %s1794_s2 = inlined_call_operand.vmem [shape: f32[1,128], index: 2, kind: input, shape index: {}]   ;;  %s1795_s3 = inlined_call_operand.hbm [shape: bf16[128,128], index: 3, kind: input, shape index: {}]   ;;  %s1796_s4 = inlined_call_operand.vmem [shape: f32[1,128], index: 4, kind: input, shape index: {}]   ;;  %s1797_s5 = inlined_call_operand.vmem [shape: f32[1,128], index: 5, kind: input, shape index: {}]   ;;  %s1798_s6 = inlined_call_operand.<no memory space> [shape: f32[1,1], index: 6, kind: input, shape index: {}]   ;;  %s1799_s7 = inlined_call_operand.vmem [shape: f32[384,1], index: 7, kind: output, shape index: {}]  }
   0x1   :  { %v12_v0 = vstv %s1798_s6 }
   0x2   :  { %13 = vst [vmem:[#allocation2] sm:$0x1] %v12_v0 }
   0x3   :  { %14 = vsyncpa [#allocation4], 0 }
   0x4   :  { %16 = vsyncpa [#allocation4 + $0x1], 0 }
   0x5   :  { %17 = vsyncpa [#allocation6], 0  ;;  %s1552_s26 = smov 0   ;;  %s1554_s27 = smov 0  }
   0x6   :  { %s1556_s28 = smov 0   ;;  %s1558_s29 = smov 0  }
   0x7 LB: > { %s1061_s6 = sadd.s32 4294967295, %s1501_s29   ;;  %p43_p0 = scmp.ne.s32.totalorder %s1493_s27, %s1489_s26  ;;  %s1501_s29 = sphi %s1558_s29, %s1808_s29   ;;  %s1497_s28 = sphi %s1556_s28, %s1807_s28   ;;  %s1493_s27 = sphi %s1554_s27, %s1806_s27   ;;  %s1489_s26 = sphi %s1552_s26, %s1805_s26  }
   0x8   : > { %p1574_p1 = scmp.eq.s32.totalorder %s1061_s6, 0  ;;  %p1063_p2 = scmp.ge.s32.totalorder %s1501_s29, 1 }
   0x9   : > { %p206_p3 = scmp.lt.s32.totalorder %s1501_s29, 4  ;;  %s217_s11 = sshll.u32 %s1793_s1, 4  ;;  %s218_s11 = int_to_ptr.hbm [resolvable:$true] %s217_s11 }
   0xa   : > { %p1582_p4 = por %p1574_p1, %p43_p0  ;;  %s1503_s13 = smov [#allocation5]  }
   0xb   : > { %p1589_p5 = pnand %p1063_p2, %p206_p3  ;;  %s219_s14 = sshll.u32 %s1503_s13, 4  ;;  %s220_s14 = int_to_ptr.vmem [resolvable:$true] %s219_s14 }
   0xc   : > { %s234_s17 = sshll.u32 %s1795_s3, 4  ;;  %s1504_s18 = smov 64   ;;  %s235_s17 = int_to_ptr.hbm [resolvable:$true] %s234_s17 }
   0xd   : > { %p1315_p6 = pneg %p1589_p5  ;;  %s1505_s19 = smov 4  }
   0xe   : > { %s1506_s20 = smov [#allocation7]   ;;  %s1601_s22 = sadd.s32 1, %s1501_s29  }
   0xf   : > { %p1316_p7 = pnand %p1315_p6, %p1574_p1  ;;  %s236_s21 = sshll.u32 %s1506_s20, 4  ;;  %s237_s21 = int_to_ptr.vmem [resolvable:$true] %s236_s21 }
  0x10   : > { %s30_s23 = sadd.s32 1, %s1497_s28  ;;  %s27_s24 = ssub.s32 %s1501_s29, %s1601_s22 }
  0x11   : > { %1318 = dma.hbm_to_vmem [thread:$0]  (!%p1316_p7), %s218_s11, 2048, %s220_s14, [#allocation6], %s1504_s18, %s1504_s18, %s1505_s19  }
  0x12   : > { %1321 = dma.hbm_to_vmem [thread:$0]  (!%p1316_p7), %s235_s17, 1024, %s237_s21, [#allocation6], %s1504_s18, %s1504_s18, %s1505_s19  }
  0x13   : > { %p37_p8 = scmp.ne.s32.totalorder %s1497_s28, %s1493_s27  ;;  %p28_p9 = scmp.eq.s32.totalorder %s27_s24, 0 }
  0x14   : > { %p38_p10 = scmp.eq.s32.totalorder %s1501_s29, 0  ;;  %p1328_p11 = scmp.lt.s32.totalorder %s1501_s29, 3 }
  0x15   : > { %s259_s25 = sand.u32 1, %s1497_s28   ;;  %s1240_s10 = sshll.u32 %s1501_s29, 7 }
  0x16   : > { %s1612_s26 = scalar_select %p28_p9, %s1497_s28, %s30_s23  }
  0x17   : > { %p39_p12 = por %p38_p10, %p37_p8  ;;  %s1067_s9 = sshll.u32 %s259_s25, 7 }
  0x18   : > { %s269_s14 = scalar_lea.hbm %s1792_s0, %s1240_s10  ;;  %s263_s16 = scalar_lea.vmem [#allocation3], %s1067_s9 }
  0x19   : > { %s270_s15 = sshll.u32 %s269_s14, 4  ;;  %s272_s17 = sshll.u32 %s263_s16, 4  ;;  %s271_s15 = int_to_ptr.hbm [resolvable:$true] %s270_s15  ;;  %s273_s17 = int_to_ptr.vmem [resolvable:$true] %s272_s17 }
  0x1a   : > { %p1618_p13 = pnand %p1328_p11, %p39_p12  ;;  %s260_s19 = scalar_lea.sflag [#allocation4], %s259_s25 }
  0x1b   : > { %s1433_s20 = sshra.s32 %s271_s15, 4  ;;  %s1440_s9 = scalar_lea.hbm %s1792_s0, 384  ;;  %s1434_s20 = int_to_ptr.hbm [resolvable:$true] %s1433_s20 }
  0x1c   : > { %s1435_s21 = scalar_lea.hbm %s1434_s20, 128  ;;  %p1437_p2 = pneg %p1618_p13 }
  0x1d   : > { %p1436_p0 = scmp.ne.s32.totalorder %s1434_s20, %s1435_s21  ;;  %p1441_p7 = scmp.lt.s32.totalorder %s1434_s20, %s1792_s0 }
  0x1e   : > { %p1442_p8 = scmp.lt.s32.totalorder %s1440_s9, %s1435_s21 }
  0x1f   : > { %p1438_p3 = pnand %p1437_p2, %p1436_p0 }
  0x20   : > { %p1443_p9 = por %p1442_p8, %p1441_p7 }
  0x21   : > { %p1439_p6 = pneg %p1438_p3 }
  0x23   : > { %p1444_p10 = pnand %p1443_p9, %p1439_p6 }
  0x25   : > { %1447 = shalt.err (!%p1444_p10)
}
  0x26   : > { %s1507_s25 = smov 128   ;;  %s1508_s13 = smov 8  }
  0x27   : > { %1325 = dma.hbm_to_vmem [thread:$0]  (!%p1618_p13), %s271_s15, 2048, %s273_s17, %s260_s19, %s1507_s25, %s1507_s25, %s1508_s13  }
  0x28   : > { %284 = sbr.rel (%p1589_p5) target bundleno = 577 (0x241), region = 48  ;;  %s286_s14 = sand.u32 (!%p1589_p5), 1, %s1493_s27  }
  0x29   : > { %s1072_s16 = sshll.u32 (!%p1589_p5), %s286_s14, 7  ;;  %s287_s23 = scalar_lea.sflag (!%p1589_p5), [#allocation4], %s286_s14 }
  0x2a   : > { %s1635_s24 = scalar_lea.vmem (!%p1589_p5), [#allocation3], %s1072_s16 }
  0x2d   : > { %1480 = dma.done.wait (%p1582_p4), %s287_s23, 2048  }
  0x2e   : > { %1482 = vsyncadd (%p1582_p4), %s287_s23, 4294965248 }
  0x2f   : > { %1484 = dma.done.wait (%p1574_p1), [#allocation6], 3072  }
  0x30   : > { %1486 = vsyncadd (%p1574_p1), [#allocation6], 4294964224  ;;  %v1264_v1 = vld [vmem:[#allocation5 + $0x38] sm:$0xff]  ;;  %v1263_v3 = vld [vmem:[#allocation5 + $0x30] sm:$0xff]  ;;  %s1075_s19 = sshll.u32 %s1061_s6, 4 }
  0x31   : > { %v1272_v2 = vld [vmem:[#allocation5 + $0x78] sm:$0xff]  ;;  %567 = vmatpush.bf16.msra.mxu0 %v1264_v1  ;;  %1281 = vmatpush.bf16.msra.mxu3 %v1264_v1  ;;  %v1271_v4 = vld [vmem:[#allocation5 + $0x70] sm:$0xff]  ;;  %v1262_v5 = vld [vmem:[#allocation5 + $0x28] sm:$0xff]  ;;  %p334_p1 = scmp.lt.s32.totalorder %s1075_s19, 47 }
  0x32   : > { %616 = vmatpush.bf16.msra.mxu1 %v1272_v2  ;;  %v1270_v6 = vld [vmem:[#allocation5 + $0x68] sm:$0xff]  ;;  %v1261_v7 = vld [vmem:[#allocation5 + $0x20] sm:$0xff]  ;;  %v1260_v9 = vld [vmem:[#allocation5 + $0x18] sm:$0xff] }
  0x33   : > { %v1269_v8 = vld [vmem:[#allocation5 + $0x60] sm:$0xff]  ;;  %v1268_v10 = vld [vmem:[#allocation5 + $0x58] sm:$0xff]  ;;  %v1259_v11 = vld [vmem:[#allocation5 + $0x10] sm:$0xff]  ;;  %s1810_s19 = smov (!%p334_p1, %s1075_s19), 47 }
  0x34   : > { %v1267_v12 = vld [vmem:[#allocation5 + $0x50] sm:$0xff]  ;;  %v1258_v13 = vld [vmem:[#allocation5 + $0x8] sm:$0xff]  ;;  %v1257_v15 = vld [vmem:[#allocation5] sm:$0xff]  ;;  %s1076_s20 = sshll.u32 %s1810_s19, 3 }
  0x35   : > { %568 = vmatpush.bf16.msra.mxu0 %v1263_v3  ;;  %1282 = vmatpush.bf16.msra.mxu3 %v1263_v3  ;;  %v1266_v14 = vld [vmem:[#allocation5 + $0x48] sm:$0xff]  ;;  %v1079_v16 = vld [vmem:[%s1635_s24] sm:$0xf]  ;;  %v1241_v21 = vld [vmem:[%s1635_s24 + $0x4] sm:$0xf]  ;;  %s1745_s10 = scalar_lea.vmem %s1799_s7, %s1076_s20 }
  0x36   : > { %617 = vmatpush.bf16.msra.mxu1 %v1271_v4  ;;  %v1242_v17 = vld [vmem:[%s1635_s24 + $0x4] sm:$0xf0]  ;;  %v1127_v18 = vld [vmem:[%s1635_s24 + $0x60] sm:$0xf]  ;;  %v1081_v22 = vld [vmem:[%s1635_s24 + $0x8] sm:$0xf0] }
  0x37   : > { %v1254_v19 = vld [vmem:[%s1635_s24 + $0x64] sm:$0xf0]  ;;  %v1265_v20 = vld [vmem:[#allocation5 + $0x40] sm:$0xff]  ;;  %v1080_v23 = vor.u32 %v1242_v17, %v1079_v16  ;;  %v1084_v25 = vor.u32 %v1241_v21, %v1081_v22  ;;  %v1087_v26 = vld [vmem:[%s1635_s24 + $0x10] sm:$0xf] }
  0x38   : > { %v1128_v24 = vor.u32 %v1254_v19, %v1127_v18  ;;  %v1244_v27 = vld [vmem:[%s1635_s24 + $0x14] sm:$0xf0]  ;;  %v1135_v28 = vld [vmem:[%s1635_s24 + $0x70] sm:$0xf]  ;;  %v1243_v30 = vld [vmem:[%s1635_s24 + $0x14] sm:$0xf] }
  0x39   : > { %569 = vmatpush.bf16.msra.mxu0 %v1262_v5  ;;  %1283 = vmatpush.bf16.msra.mxu3 %v1262_v5  ;;  %v1256_v29 = vld [vmem:[%s1635_s24 + $0x74] sm:$0xf0]  ;;  %v1089_v31 = vld [vmem:[%s1635_s24 + $0x18] sm:$0xf0]  ;;  %v1088_v32 = vor.u32 %v1244_v27, %v1087_v26  ;;  %v1095_v35 = vld [vmem:[%s1635_s24 + $0x20] sm:$0xf] }
  0x3a   : > { %618 = vmatpush.bf16.msra.mxu1 %v1270_v6  ;;  %v1136_v33 = vor.u32 %v1256_v29, %v1135_v28  ;;  %v1092_v34 = vor.u32 %v1243_v30, %v1089_v31  ;;  %v1246_v36 = vld [vmem:[%s1635_s24 + $0x24] sm:$0xf0]  ;;  %v1253_v37 = vld [vmem:[%s1635_s24 + $0x64] sm:$0xf]  ;;  %v1129_v38 = vld [vmem:[%s1635_s24 + $0x68] sm:$0xf0] }
  0x3b   : > { %v1245_v39 = vld [vmem:[%s1635_s24 + $0x24] sm:$0xf]  ;;  %v1097_v40 = vld [vmem:[%s1635_s24 + $0x28] sm:$0xf0]  ;;  %v1096_v41 = vor.u32 %v1246_v36, %v1095_v35  ;;  %v1132_v42 = vor.u32 %v1253_v37, %v1129_v38  ;;  %v1103_v44 = vld [vmem:[%s1635_s24 + $0x30] sm:$0xf] }
  0x3c   : > { %v1100_v43 = vor.u32 %v1245_v39, %v1097_v40  ;;  %v1248_v45 = vld [vmem:[%s1635_s24 + $0x34] sm:$0xf0]  ;;  %v1255_v46 = vld [vmem:[%s1635_s24 + $0x74] sm:$0xf]  ;;  %v1137_v47 = vld [vmem:[%s1635_s24 + $0x78] sm:$0xf0] }
  0x3d   : > { %570 = vmatpush.bf16.msra.mxu0 %v1261_v7  ;;  %1284 = vmatpush.bf16.msra.mxu3 %v1261_v7  ;;  %v1247_v48 = vld [vmem:[%s1635_s24 + $0x34] sm:$0xf]  ;;  %v1105_v49 = vld [vmem:[%s1635_s24 + $0x38] sm:$0xf0]  ;;  %v1104_v50 = vor.u32 %v1248_v45, %v1103_v44  ;;  %v1140_v51 = vor.u32 %v1255_v46, %v1137_v47  ;;  %v1278_v55 = vld [vmem:[#allocation7 + $0x28] sm:$0xff] }
  0x3e   : > { %619 = vmatpush.bf16.msra.mxu1 %v1269_v8  ;;  %v1108_v52 = vor.u32 %v1247_v48, %v1105_v49  ;;  %v1280_v53 = vld [vmem:[#allocation7 + $0x38] sm:$0xff]  ;;  %v1279_v54 = vld [vmem:[#allocation7 + $0x30] sm:$0xff]  ;;  %v1111_v56 = vld [vmem:[%s1635_s24 + $0x40] sm:$0xf] }
  0x3f   : > { %789 = vmatpush.bf16.msra.mxu2 %v1280_v53  ;;  %v1250_v57 = vld [vmem:[%s1635_s24 + $0x44] sm:$0xf0]  ;;  %v1249_v58 = vld [vmem:[%s1635_s24 + $0x44] sm:$0xf]  ;;  %v1113_v59 = vld [vmem:[%s1635_s24 + $0x48] sm:$0xf0] }
  0x40   : > { %v1277_v60 = vld [vmem:[#allocation7 + $0x20] sm:$0xff]  ;;  %v1112_v61 = vor.u32 %v1250_v57, %v1111_v56  ;;  %v1116_v62 = vor.u32 %v1249_v58, %v1113_v59  ;;  %v1119_v63 = vld [vmem:[%s1635_s24 + $0x50] sm:$0xf]  ;;  %v1252_v0 = vld [vmem:[%s1635_s24 + $0x54] sm:$0xf0] }
  0x41   : > { %571 = vmatpush.bf16.msra.mxu0 %v1260_v9  ;;  %1285 = vmatpush.bf16.msra.mxu3 %v1260_v9  ;;  %v1251_v1 = vld [vmem:[%s1635_s24 + $0x54] sm:$0xf]  ;;  %v1120_v3 = vor.u32 %v1252_v0, %v1119_v63  ;;  %v1276_v5 = vld [vmem:[#allocation7 + $0x18] sm:$0xff]  ;;  %v1274_v7 = vld [vmem:[#allocation7 + $0x8] sm:$0xff] }
  0x42   : > { %620 = vmatpush.bf16.msra.mxu1 %v1268_v10  ;;  %v1680_v9 = vld [vmem:[%s1794_s2] ss:$0 sm:$0xff] }
  0x43   : > { %790 = vmatpush.bf16.msra.mxu2 %v1279_v54 }
  0x45   : > { %572 = vmatpush.bf16.msra.mxu0 %v1259_v11  ;;  %1286 = vmatpush.bf16.msra.mxu3 %v1259_v11 }
  0x46   : > { %621 = vmatpush.bf16.msra.mxu1 %v1267_v12 }
  0x47   : > { %791 = vmatpush.bf16.msra.mxu2 %v1278_v55 }
  0x49   : > { %573 = vmatpush.bf16.msra.mxu0 %v1258_v13  ;;  %1287 = vmatpush.bf16.msra.mxu3 %v1258_v13 }
  0x4a   : > { %622 = vmatpush.bf16.msra.mxu1 %v1266_v14 }
  0x4b   : > { %792 = vmatpush.bf16.msra.mxu2 %v1277_v60 }
  0x4d   : > { %574 = vmatpush.bf16.msra.mxu0 %v1257_v15  ;;  %1288 = vmatpush.bf16.msra.mxu3 %v1257_v15 }
  0x4e   : > { %623 = vmatpush.bf16.msra.mxu1 %v1265_v20 }
  0x4f   : > { %793 = vmatpush.bf16.msra.mxu2 %v1276_v5 }
  0x50   : > { %575 = vmatmul.bf16.vlgmr.msra.gmra.mxu0 %v1080_v23  ;;  %605 = vmatmul.bf16.vlgmr.msra.gmra.mxu3 %v1128_v24 }
  0x51   : > { %1289 = vmatpush.bf16.msrb.mxu3 %v1272_v2  ;;  %624 = vmatmul.bf16.vlgmr.msra.gmra.mxu1 %v1084_v25  ;;  %v1121_v2 = vld [vmem:[%s1635_s24 + $0x58] sm:$0xf0] }
  0x55   : > { %1290 = vmatpush.bf16.msrb.mxu3 %v1271_v4  ;;  %v1124_v4 = vor.u32 %v1251_v1, %v1121_v2 }
  0x59   : > { %1291 = vmatpush.bf16.msrb.mxu3 %v1270_v6  ;;  %v1275_v6 = vld [vmem:[#allocation7 + $0x10] sm:$0xff] }
  0x5a   : > { %794 = vmatpush.bf16.msra.mxu2 %v1275_v6 }
  0x5d   : > { %1292 = vmatpush.bf16.msrb.mxu3 %v1269_v8  ;;  %v1273_v8 = vld [vmem:[#allocation7] sm:$0xff] }
  0x5e   : > { %795 = vmatpush.bf16.msra.mxu2 %v1274_v7 }
  0x60   : > { %580 = vmatmul.bf16.gmra.mxu0 %v1088_v32  ;;  %610 = vmatmul.bf16.gmra.mxu3 %v1136_v33 }
  0x61   : > { %1293 = vmatpush.bf16.msrb.mxu3 %v1268_v10  ;;  %629 = vmatmul.bf16.gmra.mxu1 %v1092_v34 }
  0x62   : > { %796 = vmatpush.bf16.msra.mxu2 %v1273_v8 }
  0x65   : > { %1294 = vmatpush.bf16.msrb.mxu3 %v1267_v12 }
  0x69   : > { %1295 = vmatpush.bf16.msrb.mxu3 %v1266_v14 }
  0x6d   : > { %1296 = vmatpush.bf16.msrb.mxu3 %v1265_v20 }
  0x70   : > { %585 = vmatmul.bf16.gmra.mxu0 %v1096_v41  ;;  %654 = vmatmul.bf16.vlgmr.msrb.gmra.mxu3 %v1132_v42 }
  0x71   : > { %634 = vmatmul.bf16.gmra.mxu1 %v1100_v43  ;;  %1297 = vmatpush.bf16.msra.mxu3 %v1280_v53 }
  0x75   : > { %1298 = vmatpush.bf16.msra.mxu3 %v1279_v54 }
  0x79   : > { %1299 = vmatpush.bf16.msra.mxu3 %v1278_v55 }
  0x7d   : > { %1300 = vmatpush.bf16.msra.mxu3 %v1277_v60 }
  0x80   : > { %590 = vmatmul.bf16.gmra.mxu0 %v1104_v50  ;;  %659 = vmatmul.bf16.gmra.mxu3 %v1140_v51 }
  0x81   : > { %639 = vmatmul.bf16.gmra.mxu1 %v1108_v52  ;;  %1301 = vmatpush.bf16.msra.mxu3 %v1276_v5 }
  0x85   : > { %1302 = vmatpush.bf16.msra.mxu3 %v1275_v6 }
  0x89   : > { %1303 = vmatpush.bf16.msra.mxu3 %v1274_v7 }
  0x8d   : > { %1304 = vmatpush.bf16.msra.mxu3 %v1273_v8 }
  0x90   : > { %595 = vmatmul.bf16.gmra.mxu0 %v1112_v61 }
  0x91   : > { %644 = vmatmul.bf16.gmra.mxu1 %v1116_v62 }
  0xa0   : > { %600 = vmatmul.bf16.gmra.mxu0 %v1120_v3 }
  0xa1   : > { %649 = vmatmul.bf16.gmra.mxu1 %v1124_v4 }
  0xcd   : > { %v576_v10 = vpop.f32.mrf.mxu0 }
  0xce   : > { %v625_v11 = vpop.f32.mrf.mxu1  ;;  %v577_v12 = vadd.f32 %v1680_v9, %v576_v10 }
  0xd0   : > { %v626_v14 = vadd.f32 %v625_v11, %v577_v12 }
  0xd2   : > { %v681_v18 = vmul.f32 0.2, %v626_v14  ;;  %vm665_vm0 = vcmp.gt.f32.partialorder %v626_v14, 0.0 }
  0xd3   : > { %v606_v13 = vpop.f32.mrf.mxu3 }
  0xd4   : > { %v697_v22 = vsel %vm665_vm0, %v626_v14, %v681_v18  ;;  %v607_v44 = vadd.f32 %v1680_v9, %v606_v13 }
  0xd5   : > { %v578_v15 = vpop.f32.mrf.mxu0 }
  0xd6   : > { %v579_v16 = vadd.f32 %v1680_v9, %v578_v15  ;;  %v627_v17 = vpop.f32.mrf.mxu1 }
  0xd8   : > { %v628_v19 = vadd.f32 %v627_v17, %v579_v16 }
  0xda   : > { %v682_v20 = vmul.f32 0.2, %v628_v19  ;;  %vm666_vm1 = vcmp.gt.f32.partialorder %v628_v19, 0.0 }
  0xdb   : > { %v608_v21 = vpop.f32.mrf.mxu3 }
  0xdc   : > { %v698_v23 = vsel %vm666_vm1, %v628_v19, %v682_v20  ;;  %v609_v52 = vadd.f32 %v1680_v9, %v608_v21 }
  0xdd   : > { %v581_v24 = vpop.f32.mrf.mxu0  ;;  %v713_v25 = vpack.c.bf16 %v698_v23, %v697_v22 }
  0xde   : > { %v630_v26 = vpop.f32.mrf.mxu1  ;;  %v582_v27 = vadd.f32 %v1680_v9, %v581_v24 }
  0xdf   : > { %797 = vmatmul.bf16.vlgmr.msra.gmra.mxu2 %v713_v25 }
  0xe0   : > { %v631_v29 = vadd.f32 %v630_v26, %v582_v27 }
  0xe2   : > { %v683_v33 = vmul.f32 0.2, %v631_v29  ;;  %vm667_vm2 = vcmp.gt.f32.partialorder %v631_v29, 0.0 }
  0xe3   : > { %v611_v28 = vpop.f32.mrf.mxu3 }
  0xe4   : > { %v699_v37 = vsel %vm667_vm2, %v631_v29, %v683_v33  ;;  %v612_v4 = vadd.f32 %v1680_v9, %v611_v28 }
  0xe5   : > { %v583_v30 = vpop.f32.mrf.mxu0 }
  0xe6   : > { %v584_v31 = vadd.f32 %v1680_v9, %v583_v30  ;;  %v632_v32 = vpop.f32.mrf.mxu1 }
  0xe8   : > { %v633_v34 = vadd.f32 %v632_v32, %v584_v31 }
  0xea   : > { %v684_v35 = vmul.f32 0.2, %v633_v34  ;;  %vm668_vm3 = vcmp.gt.f32.partialorder %v633_v34, 0.0 }
  0xeb   : > { %v613_v36 = vpop.f32.mrf.mxu3 }
  0xec   : > { %v700_v38 = vsel %vm668_vm3, %v633_v34, %v684_v35  ;;  %v614_v13 = vadd.f32 %v1680_v9, %v613_v36 }
  0xed   : > { %v586_v39 = vpop.f32.mrf.mxu0  ;;  %v714_v40 = vpack.c.bf16 %v700_v38, %v699_v37 }
  0xee   : > { %v635_v41 = vpop.f32.mrf.mxu1  ;;  %v587_v42 = vadd.f32 %v1680_v9, %v586_v39 }
  0xef   : > { %802 = vmatmul.bf16.gmra.mxu2 %v714_v40 }
  0xf0   : > { %v636_v45 = vadd.f32 %v635_v41, %v587_v42 }
  0xf2   : > { %v685_v49 = vmul.f32 0.2, %v636_v45  ;;  %vm669_vm4 = vcmp.gt.f32.partialorder %v636_v45, 0.0 }
  0xf3   : > { %v655_v43 = vpop.f32.mrf.mxu3 }
  0xf4   : > { %v656_v50 = vadd.f32 %v655_v43, %v607_v44  ;;  %v701_v57 = vsel %vm669_vm4, %v636_v45, %v685_v49 }
  0xf5   : > { %v588_v46 = vpop.f32.mrf.mxu0 }
  0xf6   : > { %v589_v47 = vadd.f32 %v1680_v9, %v588_v46  ;;  %v637_v48 = vpop.f32.mrf.mxu1  ;;  %v693_v55 = vmul.f32 0.2, %v656_v50  ;;  %vm677_vm6 = vcmp.gt.f32.partialorder %v656_v50, 0.0 }
  0xf8   : > { %v638_v51 = vadd.f32 %v637_v48, %v589_v47  ;;  %v709_v63 = vsel %vm677_vm6, %v656_v50, %v693_v55 }
  0xfa   : > { %v686_v53 = vmul.f32 0.2, %v638_v51  ;;  %vm670_vm5 = vcmp.gt.f32.partialorder %v638_v51, 0.0 }
  0xfb   : > { %v657_v54 = vpop.f32.mrf.mxu3 }
  0xfc   : > { %v658_v56 = vadd.f32 %v657_v54, %v609_v52  ;;  %v702_v58 = vsel %vm670_vm5, %v638_v51, %v686_v53  ;;  %v1701_v51 = vld [vmem:[%s1796_s4] ss:$0 sm:$0xff] }
  0xfd   : > { %v591_v59 = vpop.f32.mrf.mxu0  ;;  %v715_v60 = vpack.c.bf16 %v702_v58, %v701_v57 }
  0xfe   : > { %vm678_vm7 = vcmp.gt.f32.partialorder %v658_v56, 0.0  ;;  %v694_v61 = vmul.f32 0.2, %v658_v56  ;;  %v640_v62 = vpop.f32.mrf.mxu1  ;;  %v592_v1 = vadd.f32 %v1680_v9, %v591_v59 }
  0xff   : > { %807 = vmatmul.bf16.gmra.mxu2 %v715_v60 }
 0x100   : > { %v710_v0 = vsel %vm678_vm7, %v658_v56, %v694_v61  ;;  %v641_v5 = vadd.f32 %v640_v62, %v592_v1 }
 0x101   : > { %v719_v2 = vpack.c.bf16 %v710_v0, %v709_v63 }
 0x102   : > { %v687_v10 = vmul.f32 0.2, %v641_v5  ;;  %vm671_vm8 = vcmp.gt.f32.partialorder %v641_v5, 0.0 }
 0x103   : > { %v660_v3 = vpop.f32.mrf.mxu3  ;;  %827 = vmatmul.bf16.vlgmr.msra.gmra.mxu3 %v719_v2 }
 0x104   : > { %v661_v11 = vadd.f32 %v660_v3, %v612_v4  ;;  %v703_v18 = vsel %vm671_vm8, %v641_v5, %v687_v10 }
 0x105   : > { %v593_v6 = vpop.f32.mrf.mxu0 }
 0x106   : > { %v594_v7 = vadd.f32 %v1680_v9, %v593_v6  ;;  %v642_v8 = vpop.f32.mrf.mxu1  ;;  %v695_v16 = vmul.f32 0.2, %v661_v11  ;;  %vm679_vm10 = vcmp.gt.f32.partialorder %v661_v11, 0.0 }
 0x108   : > { %v643_v12 = vadd.f32 %v642_v8, %v594_v7  ;;  %v711_v25 = vsel %vm679_vm10, %v661_v11, %v695_v16 }
 0x10a   : > { %v688_v14 = vmul.f32 0.2, %v643_v12  ;;  %vm672_vm9 = vcmp.gt.f32.partialorder %v643_v12, 0.0 }
 0x10b   : > { %v662_v15 = vpop.f32.mrf.mxu3 }
 0x10c   : > { %v663_v17 = vadd.f32 %v662_v15, %v614_v13  ;;  %v704_v19 = vsel %vm672_vm9, %v643_v12, %v688_v14 }
 0x10d   : > { %v596_v20 = vpop.f32.mrf.mxu0  ;;  %v716_v21 = vpack.c.bf16 %v704_v19, %v703_v18 }
 0x10e   : > { %v696_v22 = vmul.f32 0.2, %v663_v17  ;;  %v645_v23 = vpop.f32.mrf.mxu1  ;;  %vm680_vm11 = vcmp.gt.f32.partialorder %v663_v17, 0.0  ;;  %v597_v24 = vadd.f32 %v1680_v9, %v596_v20 }
 0x10f   : > { %812 = vmatmul.bf16.gmra.mxu2 %v716_v21 }
 0x110   : > { %v712_v26 = vsel %vm680_vm11, %v663_v17, %v696_v22  ;;  %v646_v28 = vadd.f32 %v645_v23, %v597_v24 }
 0x111   : > { %v720_v27 = vpack.c.bf16 %v712_v26, %v711_v25 }
 0x112   : > { %v689_v32 = vmul.f32 0.2, %v646_v28  ;;  %vm673_vm12 = vcmp.gt.f32.partialorder %v646_v28, 0.0 }
 0x113   : > { %832 = vmatmul.bf16.gmra.mxu3 %v720_v27 }
 0x114   : > { %v705_v35 = vsel %vm673_vm12, %v646_v28, %v689_v32 }
 0x115   : > { %v598_v29 = vpop.f32.mrf.mxu0 }
 0x116   : > { %v599_v30 = vadd.f32 %v1680_v9, %v598_v29  ;;  %v647_v31 = vpop.f32.mrf.mxu1 }
 0x118   : > { %v648_v33 = vadd.f32 %v647_v31, %v599_v30 }
 0x11a   : > { %v690_v34 = vmul.f32 0.2, %v648_v33  ;;  %vm674_vm13 = vcmp.gt.f32.partialorder %v648_v33, 0.0 }
 0x11c   : > { %v706_v36 = vsel %vm674_vm13, %v648_v33, %v690_v34 }
 0x11d   : > { %v601_v37 = vpop.f32.mrf.mxu0  ;;  %v717_v38 = vpack.c.bf16 %v706_v36, %v705_v35 }
 0x11e   : > { %v650_v39 = vpop.f32.mrf.mxu1  ;;  %v602_v40 = vadd.f32 %v1680_v9, %v601_v37 }
 0x11f   : > { %817 = vmatmul.bf16.gmra.mxu2 %v717_v38 }
 0x120   : > { %v651_v41 = vadd.f32 %v650_v39, %v602_v40 }
 0x122   : > { %v691_v45 = vmul.f32 0.2, %v651_v41  ;;  %vm675_vm14 = vcmp.gt.f32.partialorder %v651_v41, 0.0 }
 0x124   : > { %v707_v48 = vsel %vm675_vm14, %v651_v41, %v691_v45 }
 0x125   : > { %v603_v42 = vpop.f32.mrf.mxu0 }
 0x126   : > { %v604_v43 = vadd.f32 %v1680_v9, %v603_v42  ;;  %v652_v44 = vpop.f32.mrf.mxu1  ;;  %v1707_v9 = vld [vmem:[%s1797_s5] ss:$0 sm:$0xff] }
 0x128   : > { %v653_v46 = vadd.f32 %v652_v44, %v604_v43 }
 0x12a   : > { %v692_v47 = vmul.f32 0.2, %v653_v46  ;;  %vm676_vm15 = vcmp.gt.f32.partialorder %v653_v46, 0.0 }
 0x12c   : > { %v708_v49 = vsel %vm676_vm15, %v653_v46, %v692_v47 }
 0x12d   : > { %v718_v50 = vpack.c.bf16 %v708_v49, %v707_v48 }
 0x12f   : > { %822 = vmatmul.bf16.gmra.mxu2 %v718_v50 }
 0x162   : > { %v798_v52 = vpop.f32.mrf.mxu2 }
 0x163   : > { %v799_v53 = vadd.f32 %v1701_v51, %v798_v52 }
 0x165   : > { %v854_v54 = vmul.f32 0.2, %v799_v53  ;;  %vm838_vm0 = vcmp.gt.f32.partialorder %v799_v53, 0.0 }
 0x167   : > { %v870_v55 = vsel %vm838_vm0, %v799_v53, %v854_v54  ;;  %vm958_vm0 = vcmask 7168  }
 0x168   : > { %v890_v56 = vmul.f32 %v1707_v9, %v870_v55 }
 0x16a   : > { %v800_v57 = vpop.f32.mrf.mxu2  ;;  %906 = vadd.xlane.f32.xlu0 %v890_v56 }
 0x16b   : > { %v801_v58 = vadd.f32 %v1701_v51, %v800_v57 }
 0x16d   : > { %v855_v59 = vmul.f32 0.2, %v801_v58  ;;  %vm839_vm1 = vcmp.gt.f32.partialorder %v801_v58, 0.0 }
 0x16f   : > { %v871_v60 = vsel %vm839_vm1, %v801_v58, %v855_v59 }
 0x170   : > { %v891_v61 = vmul.f32 %v1707_v9, %v871_v60 }
 0x172   : > { %v803_v62 = vpop.f32.mrf.mxu2  ;;  %908 = vadd.xlane.f32.xlu0 %v891_v61 }
 0x173   : > { %v804_v63 = vadd.f32 %v1701_v51, %v803_v62 }
 0x175   : > { %v856_v0 = vmul.f32 0.2, %v804_v63  ;;  %vm840_vm2 = vcmp.gt.f32.partialorder %v804_v63, 0.0 }
 0x177   : > { %v872_v1 = vsel %vm840_vm2, %v804_v63, %v856_v0 }
 0x178   : > { %v892_v2 = vmul.f32 %v1707_v9, %v872_v1 }
 0x17a   : > { %v805_v3 = vpop.f32.mrf.mxu2  ;;  %910 = vadd.xlane.f32.xlu1 %v892_v2 }
 0x17b   : > { %v806_v4 = vadd.f32 %v1701_v51, %v805_v3 }
 0x17d   : > { %v857_v5 = vmul.f32 0.2, %v806_v4  ;;  %vm841_vm3 = vcmp.gt.f32.partialorder %v806_v4, 0.0 }
 0x17f   : > { %v873_v6 = vsel %vm841_vm3, %v806_v4, %v857_v5 }
 0x180   : > { %v893_v7 = vmul.f32 %v1707_v9, %v873_v6 }
 0x182   : > { %v808_v8 = vpop.f32.mrf.mxu2  ;;  %912 = vadd.xlane.f32.xlu1 %v893_v7 }
 0x183   : > { %v809_v10 = vadd.f32 %v1701_v51, %v808_v8 }
 0x185   : > { %v858_v11 = vmul.f32 0.2, %v809_v10  ;;  %vm842_vm4 = vcmp.gt.f32.partialorder %v809_v10, 0.0 }
 0x186   : > { %v828_v12 = vpop.f32.mrf.mxu3 }
 0x187   : > { %v829_v13 = vadd.f32 %v1701_v51, %v828_v12  ;;  %v874_v14 = vsel %vm842_vm4, %v809_v10, %v858_v11 }
 0x188   : > { %v894_v15 = vmul.f32 %v1707_v9, %v874_v14 }
 0x189   : > { %v866_v16 = vmul.f32 0.2, %v829_v13  ;;  %vm850_vm5 = vcmp.gt.f32.partialorder %v829_v13, 0.0 }
 0x18a   : > { %v810_v17 = vpop.f32.mrf.mxu2  ;;  %914 = vadd.xlane.f32.xlu2 %v894_v15 }
 0x18b   : > { %v811_v18 = vadd.f32 %v1701_v51, %v810_v17  ;;  %v882_v19 = vsel %vm850_vm5, %v829_v13, %v866_v16 }
 0x18c   : > { %v902_v20 = vmul.f32 %v1707_v9, %v882_v19 }
 0x18d   : > { %v859_v21 = vmul.f32 0.2, %v811_v18  ;;  %vm843_vm6 = vcmp.gt.f32.partialorder %v811_v18, 0.0 }
 0x18e   : > { %930 = vadd.xlane.f32.xlu0 %v902_v20  ;;  %v830_v27 = vpop.f32.mrf.mxu3 }
 0x18f   : > { %v875_v22 = vsel %vm843_vm6, %v811_v18, %v859_v21  ;;  %v831_v52 = vadd.f32 %v1701_v51, %v830_v27 }
 0x190   : > { %v895_v23 = vmul.f32 %v1707_v9, %v875_v22 }
 0x191   : > { %v867_v58 = vmul.f32 0.2, %v831_v52  ;;  %vm851_vm13 = vcmp.gt.f32.partialorder %v831_v52, 0.0 }
 0x192   : > { %v813_v24 = vpop.f32.mrf.mxu2  ;;  %916 = vadd.xlane.f32.xlu2 %v895_v23 }
 0x193   : > { %v814_v25 = vadd.f32 %v1701_v51, %v813_v24  ;;  %v883_v63 = vsel %vm851_vm13, %v831_v52, %v867_v58 }
 0x194   : > { %v903_v2 = vmul.f32 %v1707_v9, %v883_v63 }
 0x195   : > { %v860_v26 = vmul.f32 0.2, %v814_v25  ;;  %vm844_vm7 = vcmp.gt.f32.partialorder %v814_v25, 0.0 }
 0x196   : > { %v833_v34 = vpop.f32.mrf.mxu3 }
 0x197   : > { %v876_v28 = vsel %vm844_vm7, %v814_v25, %v860_v26  ;;  %v834_v61 = vadd.f32 %v1701_v51, %v833_v34 }
 0x198   : > { %v896_v29 = vmul.f32 %v1707_v9, %v876_v28 }
 0x199   : > { %v868_v3 = vmul.f32 0.2, %v834_v61  ;;  %vm852_vm15 = vcmp.gt.f32.partialorder %v834_v61, 0.0 }
 0x19a   : > { %v815_v30 = vpop.f32.mrf.mxu2  ;;  %918 = vadd.xlane.f32.xlu0 %v896_v29 }
 0x19b   : > { %v816_v31 = vadd.f32 %v1701_v51, %v815_v30  ;;  %v884_v4 = vsel %vm852_vm15, %v834_v61, %v868_v3 }
 0x19c   : > { %v904_v5 = vmul.f32 %v1707_v9, %v884_v4 }
 0x19d   : > { %v861_v32 = vmul.f32 0.2, %v816_v31  ;;  %vm845_vm8 = vcmp.gt.f32.partialorder %v816_v31, 0.0 }
 0x19e   : > { %v835_v41 = vpop.f32.mrf.mxu3 }
 0x19f   : > { %v877_v33 = vsel %vm845_vm8, %v816_v31, %v861_v32  ;;  %v836_v44 = vadd.f32 %v1701_v51, %v835_v41 }
 0x1a0   : > { %v897_v35 = vmul.f32 %v1707_v9, %v877_v33 }
 0x1a1   : > { %v869_v48 = vmul.f32 0.2, %v836_v44  ;;  %vm853_vm11 = vcmp.gt.f32.partialorder %v836_v44, 0.0 }
 0x1a2   : > { %v818_v36 = vpop.f32.mrf.mxu2  ;;  %920 = vadd.xlane.f32.xlu1 %v897_v35 }
 0x1a3   : > { %v819_v37 = vadd.f32 %v1701_v51, %v818_v36  ;;  %v885_v54 = vsel %vm853_vm11, %v836_v44, %v869_v48 }
 0x1a4   : > { %v905_v57 = vmul.f32 %v1707_v9, %v885_v54 }
 0x1a5   : > { %v862_v38 = vmul.f32 0.2, %v819_v37  ;;  %vm846_vm9 = vcmp.gt.f32.partialorder %v819_v37, 0.0 }
 0x1a7   : > { %v878_v39 = vsel %vm846_vm9, %v819_v37, %v862_v38 }
 0x1a8   : > { %v898_v40 = vmul.f32 %v1707_v9, %v878_v39 }
 0x1aa   : > { %v820_v42 = vpop.f32.mrf.mxu2  ;;  %922 = vadd.xlane.f32.xlu2 %v898_v40 }
 0x1ab   : > { %v821_v43 = vadd.f32 %v1701_v51, %v820_v42 }
 0x1ad   : > { %v863_v45 = vmul.f32 0.2, %v821_v43  ;;  %vm847_vm10 = vcmp.gt.f32.partialorder %v821_v43, 0.0 }
 0x1af   : > { %v879_v46 = vsel %vm847_vm10, %v821_v43, %v863_v45 }
 0x1b0   : > { %v899_v47 = vmul.f32 %v1707_v9, %v879_v46 }
 0x1b2   : > { %v823_v49 = vpop.f32.mrf.mxu2  ;;  %924 = vadd.xlane.f32.xlu0 %v899_v47 }
 0x1b3   : > { %v824_v50 = vadd.f32 %v1701_v51, %v823_v49 }
 0x1b5   : > { %v864_v53 = vmul.f32 0.2, %v824_v50  ;;  %vm848_vm12 = vcmp.gt.f32.partialorder %v824_v50, 0.0 }
 0x1b7   : > { %v880_v55 = vsel %vm848_vm12, %v824_v50, %v864_v53 }
 0x1b8   : > { %v900_v56 = vmul.f32 %v1707_v9, %v880_v55 }
 0x1ba   : > { %v825_v59 = vpop.f32.mrf.mxu2  ;;  %926 = vadd.xlane.f32.xlu1 %v900_v56  ;;  %936 = vadd.xlane.f32.xlu0 %v905_v57 }
 0x1bb   : > { %v826_v60 = vadd.f32 %v1701_v51, %v825_v59  ;;  %v1372_v51 = vld [vmem:[#allocation2] ss:$0 sm:$0xff] }
 0x1bd   : > { %v865_v62 = vmul.f32 0.2, %v826_v60  ;;  %vm849_vm14 = vcmp.gt.f32.partialorder %v826_v60, 0.0 }
 0x1bf   : > { %v881_v0 = vsel %vm849_vm14, %v826_v60, %v865_v62 }
 0x1c0   : > { %v901_v1 = vmul.f32 %v1707_v9, %v881_v0 }
 0x1c2   : > { %928 = vadd.xlane.f32.xlu2 %v901_v1  ;;  %932 = vadd.xlane.f32.xlu1 %v903_v2 }
 0x1ca   : > { %934 = vadd.xlane.f32.xlu2 %v904_v5 }
 0x1dd   : > { %v907_v6 = vpop.xlane.xlu0 %906 }
 0x1de   : > { %v942_v9 = vadd.f32 %v1372_v51, %v907_v6 }
 0x1e0   : > { %959 = vst.msk [vmem:[%s1745_s10] sm:$0xff] %vm958_vm0, %v942_v9 }
 0x1e5   : > { %v909_v7 = vpop.xlane.xlu0 %908 }
 0x1e6   : > { %v943_v8 = vadd.f32 %v1372_v51, %v909_v7 }
 0x1e8   : > { %960 = vst.msk [vmem:[%s1745_s10 + $0x8] sm:$0xff] %vm958_vm0, %v943_v8 }
 0x1ed   : > { %v911_v10 = vpop.xlane.xlu1 %910 }
 0x1ee   : > { %v944_v11 = vadd.f32 %v1372_v51, %v911_v10 }
 0x1f0   : > { %961 = vst.msk [vmem:[%s1745_s10 + $0x10] sm:$0xff] %vm958_vm0, %v944_v11 }
 0x1f5   : > { %v913_v12 = vpop.xlane.xlu1 %912 }
 0x1f6   : > { %v945_v13 = vadd.f32 %v1372_v51, %v913_v12 }
 0x1f8   : > { %962 = vst.msk [vmem:[%s1745_s10 + $0x18] sm:$0xff] %vm958_vm0, %v945_v13 }
 0x1fd   : > { %v915_v14 = vpop.xlane.xlu2 %914 }
 0x1fe   : > { %v946_v15 = vadd.f32 %v1372_v51, %v915_v14 }
 0x200   : > { %963 = vst.msk [vmem:[%s1745_s10 + $0x20] sm:$0xff] %vm958_vm0, %v946_v15 }
 0x201   : > { %v931_v16 = vpop.xlane.xlu0 %930 }
 0x202   : > { %v954_v17 = vadd.f32 %v1372_v51, %v931_v16 }
 0x204   : > { %971 = vst.msk [vmem:[%s1745_s10 + $0x60] sm:$0xff] %vm958_vm0, %v954_v17 }
 0x205   : > { %v917_v18 = vpop.xlane.xlu2 %916 }
 0x206   : > { %v947_v19 = vadd.f32 %v1372_v51, %v917_v18 }
 0x208   : > { %964 = vst.msk [vmem:[%s1745_s10 + $0x28] sm:$0xff] %vm958_vm0, %v947_v19 }
 0x20d   : > { %v919_v20 = vpop.xlane.xlu0 %918 }
 0x20e   : > { %v948_v21 = vadd.f32 %v1372_v51, %v919_v20 }
 0x210   : > { %965 = vst.msk [vmem:[%s1745_s10 + $0x30] sm:$0xff] %vm958_vm0, %v948_v21 }
 0x215   : > { %v921_v22 = vpop.xlane.xlu1 %920 }
 0x216   : > { %v949_v23 = vadd.f32 %v1372_v51, %v921_v22 }
 0x218   : > { %966 = vst.msk [vmem:[%s1745_s10 + $0x38] sm:$0xff] %vm958_vm0, %v949_v23 }
 0x21d   : > { %v923_v24 = vpop.xlane.xlu2 %922 }
 0x21e   : > { %v950_v25 = vadd.f32 %v1372_v51, %v923_v24 }
 0x220   : > { %967 = vst.msk [vmem:[%s1745_s10 + $0x40] sm:$0xff] %vm958_vm0, %v950_v25 }
 0x225   : > { %v925_v26 = vpop.xlane.xlu0 %924 }
 0x226   : > { %v951_v27 = vadd.f32 %v1372_v51, %v925_v26 }
 0x228   : > { %968 = vst.msk [vmem:[%s1745_s10 + $0x48] sm:$0xff] %vm958_vm0, %v951_v27 }
 0x22d   : > { %v927_v28 = vpop.xlane.xlu1 %926  ;;  %v937_v29 = vpop.xlane.xlu0 %936 }
 0x22e   : > { %v952_v30 = vadd.f32 %v1372_v51, %v927_v28  ;;  %v957_v31 = vadd.f32 %v1372_v51, %v937_v29 }
 0x230   : > { %969 = vst.msk [vmem:[%s1745_s10 + $0x50] sm:$0xff] %vm958_vm0, %v952_v30 }
 0x231   : > { %974 = vst.msk [vmem:[%s1745_s10 + $0x78] sm:$0xff] %vm958_vm0, %v957_v31 }
 0x235   : > { %v929_v32 = vpop.xlane.xlu2 %928  ;;  %v933_v33 = vpop.xlane.xlu1 %932 }
 0x236   : > { %v953_v34 = vadd.f32 %v1372_v51, %v929_v32  ;;  %v955_v35 = vadd.f32 %v1372_v51, %v933_v33 }
 0x238   : > { %970 = vst.msk [vmem:[%s1745_s10 + $0x58] sm:$0xff] %vm958_vm0, %v953_v34 }
 0x239   : > { %972 = vst.msk [vmem:[%s1745_s10 + $0x68] sm:$0xff] %vm958_vm0, %v955_v35 }
 0x23d   : > { %v935_v36 = vpop.xlane.xlu2 %934 }
 0x23e   : > { %v956_v37 = vadd.f32 %v1372_v51, %v935_v36 }
 0x240   : > { %973 = vst.msk [vmem:[%s1745_s10 + $0x70] sm:$0xff] %vm958_vm0, %v956_v37 }
 0x241 PF: > { %s1804_s29 = smov %s1612_s26  ;;  %p20_p4 = scmp.ge.s32.totalorder %s1601_s22, 5  }
 0x242   : > { %s1805_s26 = smov %s1493_s27  ;;  %s1806_s27 = smov %s1497_s28 }
 0x243   : > { %s1807_s28 = smov %s1804_s29  ;;  %s1808_s29 = smov %s1601_s22 }
 0x244   :  { %22 = sbr.rel (!%p20_p4) target bundleno = 7 (0x7), region = 96 }
 0x249   :  { %997 = vsyncpa [#allocation4], 1 }
 0x24a   :  { %999 = vsyncpa [#allocation4 + $0x1], 1 }
 0x24b   :  { %1000 = vsyncpa [#allocation6], 1 }

</bundles_post_ra>
